<compile_context>
chip_gen: v6e
topology: v6e:2x2x1
jax: 0.10.0
libtpu: 0.0.40
codegen_flags: <defaults>
</compile_context>

<pallas_src>
import functools

import jax
import jax.numpy as jnp
from jax import lax
from jax.experimental import pallas as pl
from jax.experimental.pallas import tpu as pltpu


def _round_up(x: int, n: int) -> int:
    return ((x + n - 1) // n) * n


# Known-good configuration: fits every generation's default scoped-VMEM limit.
_CONSERVATIVE = dict(block_bytes=2 << 20, vmem_limit=None, nsplit=1, core_parallel=False)


def _tuned_config() -> dict:
    """Per-generation tile size / VMEM limit / core-split settings (best effort)."""
    kind = ""
    try:
        kind = jax.devices()[0].device_kind.lower()
    except Exception:
        pass
    if "v7" in kind:
        # 3.2 TB/s HBM: large blocks amortize the ~0.35us per-grid-step overhead;
        # two TensorCores -> genuinely shard the leading grid axis across cores.
        return dict(block_bytes=8 << 20, vmem_limit=56 << 20, nsplit=2, core_parallel=True)
    if "v6" in kind:
        # Single TensorCore; 2 inputs x 2 buffers x 6 MiB needs the limit raised.
        return dict(block_bytes=6 << 20, vmem_limit=64 << 20, nsplit=1, core_parallel=False)
    if "v5p" in kind or "v4" in kind:
        # Megacore: plain "parallel" on the leading axis shards across two cores.
        return dict(block_bytes=4 << 20, vmem_limit=64 << 20, nsplit=2, core_parallel=False)
    # v5e / unknown: stay inside the 16 MiB default scoped-VMEM limit.
    return dict(_CONSERVATIVE)


def _choose_2d_dims(shape, n):
    """A zero-copy (R, C) view of the flat data.

    Prefer a lane-dense C (multiple of 128) when it divides n; otherwise fall
    back to the array's own trailing dim.  Returns None when no cheap view
    exists (caller then uses the fused-XLA path)."""
    for lane in (512, 1024, 256, 128):
        if n % lane == 0:
            return n // lane, lane
    if len(shape) >= 2 and 0 < shape[-1] <= 2048:
        return n // shape[-1], shape[-1]
    return None


def _sum_pow_kernel(o_ref, t_ref, part_ref, acc_ref, *, m, group, tile_r, tile_c,
                    total_rows, blocks_r, steps, need_row_mask, need_ghost_skip,
                    unroll):
    """Accumulate sum(|o - t| ** m) of one split into part_ref[0, 0].

    Grid is (nsplit, steps); axis 1 is the reduction axis.  acc_ref is a
    (group, tile_c) f32 VMEM accumulator; the only cross-lane/sublane reduce
    happens once per split, on the last step."""
    c = pl.program_id(0)
    i = pl.program_id(1)

    @pl.when(i == 0)
    def _init():
        acc_ref[...] = jnp.zeros_like(acc_ref)

    rb = c * steps + i  # global row-block index handled by this step

    def _accumulate():
        ngroups = tile_r // group

        def body(g, carry):
            r0 = pl.multiple_of(g * group, group)
            a = o_ref[pl.ds(r0, group), :].astype(jnp.float32)
            b = t_ref[pl.ds(r0, group), :].astype(jnp.float32)
            d = a - b
            if need_row_mask:
                # Ragged last block: rows past the array end are DMA'd with
                # unspecified values -> zero their contribution.
                row = (rb * tile_r + r0
                       + lax.broadcasted_iota(jnp.int32, (group, tile_c), 0))
                d = jnp.where(row < total_rows, d, 0.0)
            if m % 2 == 0:
                p = d ** m            # even power: abs is redundant
            else:
                p = jnp.abs(d) ** m   # m is a static int -> integer_pow chain
            acc_ref[...] += p         # pure VPU elementwise adds, no big temp
            return carry

        lax.fori_loop(0, ngroups, body, 0, unroll=unroll)

    if need_ghost_skip:
        # When nsplit does not divide the row-block count, the trailing steps of
        # the last split are "ghosts" (their DMA index was clamped); skip them.
        pl.when(rb < blocks_r)(_accumulate)
    else:
        _accumulate()

    @pl.when(i == pl.num_programs(1) - 1)
    def _finalize():
        part_ref[0, 0] = jnp.sum(acc_ref[...])


def _pallas_sum_pow_2d(o2, t2, m, cfg):
    """sum(|o2 - t2| ** m) over a 2-D pair; returns (nsplit, 1) f32 partial sums."""
    R, C = o2.shape
    itemsize = max(jnp.dtype(o2.dtype).itemsize, jnp.dtype(t2.dtype).itemsize)
    # Sub-32-bit dtypes pack 2/4 rows per sublane: keep row counts aligned to the
    # packing (8 rows f32, 16 bf16, 32 int8) so loads stay fully packed.
    row_align = 8 * max(1, 4 // itemsize)
    padded_c = _round_up(C, 128)

    # Rows per streaming group: ~8 f32 vregs per operand -> small live ranges,
    # no materialized (tile_r, C) intermediate.
    group = max(row_align, ((8 * 1024) // padded_c) // row_align * row_align)
    group = min(group, _round_up(R, row_align))

    # Rows per block: ~cfg["block_bytes"] per operand per pipeline buffer
    # (2 inputs x 2 buffers of this size must fit the scoped VMEM limit).
    rows_cap = max(group, (int(cfg["block_bytes"]) // max(1, C * itemsize)) // group * group)
    tile_r = min(rows_cap, _round_up(R, group))

    blocks_r = pl.cdiv(R, tile_r)
    nsplit = max(1, min(int(cfg["nsplit"]), blocks_r))
    steps = pl.cdiv(blocks_r, nsplit)
    need_ghost_skip = steps * nsplit != blocks_r
    need_row_mask = tile_r * blocks_r != R

    ngroups = tile_r // group
    unroll = True if ngroups <= 8 else 4

    kernel = functools.partial(
        _sum_pow_kernel, m=m, group=group, tile_r=tile_r, tile_c=C,
        total_rows=R, blocks_r=blocks_r, steps=steps,
        need_row_mask=need_row_mask, need_ghost_skip=need_ghost_skip,
        unroll=unroll)

    def in_idx(c, i):
        rb = c * steps + i
        if need_ghost_skip:
            rb = jnp.minimum(rb, blocks_r - 1)  # keep ghost-step DMAs in bounds
        return (rb, 0)

    if cfg["core_parallel"] and nsplit > 1:
        split_sem = pltpu.CORE_PARALLEL        # v7x: shard splits across both TCs
    elif nsplit > 1:
        split_sem = "parallel"                 # megacore sharding
    else:
        split_sem = "arbitrary"

    extra = {}
    if cfg["vmem_limit"] is not None:
        extra["vmem_limit_bytes"] = int(cfg["vmem_limit"])

    return pl.pallas_call(
        kernel,
        out_shape=jax.ShapeDtypeStruct((nsplit, 1), jnp.float32),
        grid_spec=pltpu.PrefetchScalarGridSpec(
            num_scalar_prefetch=0,
            grid=(nsplit, steps),
            in_specs=[pl.BlockSpec((tile_r, C), in_idx),
                      pl.BlockSpec((tile_r, C), in_idx)],
            # One (1, 1) SMEM partial-sum slot per split, resident across the
            # reduction axis.
            out_specs=pl.BlockSpec((1, 1), lambda c, i: (c, 0),
                                   memory_space=pltpu.MemorySpace.SMEM),
            scratch_shapes=[pltpu.VMEM((group, C), jnp.float32)],
        ),
        compiler_params=pltpu.CompilerParams(
            dimension_semantics=(split_sem, "arbitrary"), **extra),
    )(o2, t2)


def powered_absolute_loss(output: jax.Array, target: jax.Array, m: int, *,
                          pallas_min_elements: int = 65536,
                          pallas_block_bytes: int | None = None) -> jax.Array:
    """Pallas implementation of PoweredAbsoluteLoss(m).forward(output, target).

    Returns mean(|output - target| ** m) in the promoted floating dtype of the
    inputs.  Inputs with fewer than `pallas_min_elements` elements use a fused
    XLA reduction (the Pallas launch would be pure overhead for tiny tensors).
    """
    if output.shape != target.shape:
        raise ValueError("output and target must have the same shape")
    m = int(m)

    out_dt = jnp.result_type(output.dtype, target.dtype)
    if not jnp.issubdtype(out_dt, jnp.floating):
        out_dt = jnp.float32

    n = int(output.size)
    if m == 0:
        # torch: diff ** 0 == 1 everywhere (0 ** 0 == 1) -> the mean is exactly 1.
        return jnp.asarray(1.0, dtype=out_dt)
    if m < 0:
        raise ValueError("m must be a non-negative integer")
    if n == 0:
        # torch.mean over an empty tensor is NaN.
        return jnp.asarray(jnp.nan, dtype=out_dt)

    def xla_path():
        d = jnp.abs(output.astype(jnp.float32) - target.astype(jnp.float32))
        return jnp.mean(d ** m).astype(out_dt)

    if n < pallas_min_elements:
        return xla_path()

    dims = _choose_2d_dims(output.shape, n)
    if dims is None or dims[0] < 8:
        # TODO(synk): no cheap zero-copy lane-friendly 2-D view (e.g. odd n with a
        # very wide trailing dim); use the fused XLA reduction instead of copying.
        return xla_path()
    R, C = dims
    o2 = output.reshape(R, C)   # contiguous reshape: zero-copy view, no HBM traffic
    t2 = target.reshape(R, C)

    cfg = dict(_tuned_config())
    if pallas_block_bytes is not None:
        cfg["block_bytes"] = int(pallas_block_bytes)

    try:
        partials = _pallas_sum_pow_2d(o2, t2, m, cfg)
    except Exception:
        # Speculative per-generation settings (e.g. CORE_PARALLEL on v7x) failed:
        # retry with the known-good conservative configuration.
        cons = dict(_CONSERVATIVE)
        if pallas_block_bytes is not None:
            cons["block_bytes"] = int(pallas_block_bytes)
        if cfg == cons:
            raise
        partials = _pallas_sum_pow_2d(o2, t2, m, cons)

    total = jnp.sum(partials)
    return (total / jnp.float32(n)).astype(out_dt)


if __name__ == "__main__":
    M = 3

    # Shapes consistent with the module's forward(): (batch_size, num_classes).
    batch, num_classes = 16, 32
    key = jax.random.PRNGKey(0)
    k_out, k_tgt = jax.random.split(key)
    output = jax.random.normal(k_out, (batch, num_classes), dtype=jnp.float32)
    target = jax.random.normal(k_tgt, (batch, num_classes), dtype=jnp.float32)

    # Default call: 512 elements is far below the Pallas threshold, so this goes
    # through the fused-XLA fast path (a Pallas launch would be 100% overhead).
    loss = jax.block_until_ready(powered_absolute_loss(output, target, M))
    ref = jnp.mean(jnp.abs(output - target) ** M)
    assert jnp.allclose(loss, ref, rtol=1e-5, atol=1e-6), (loss, ref)

    # Exercise the Pallas kernel itself (pallas_min_elements=0 forces it) on small
    # shapes covering: the lane-dense flat path, ragged-row masking, the native
    # 2-D path (trailing dim not a multiple of 128), multi-step accumulation
    # (small block override), ghost-step skipping and a sub-32-bit dtype.
    cases = [
        dict(shape=(64, 64),   dtype=jnp.float32,  m=3, block=None,       tol=1e-5),
        dict(shape=(300, 257), dtype=jnp.float32,  m=3, block=64 * 1024,  tol=1e-5),
        dict(shape=(33, 96),   dtype=jnp.float32,  m=2, block=None,       tol=1e-5),
        dict(shape=(512, 512), dtype=jnp.float32,  m=4, block=128 * 1024, tol=1e-5),
        dict(shape=(96, 512),  dtype=jnp.bfloat16, m=3, block=None,       tol=2e-2),
    ]
    for idx, case in enumerate(cases):
        ka, kb = jax.random.split(jax.random.PRNGKey(idx + 1))
        a = jax.random.normal(ka, case["shape"], dtype=case["dtype"])
        b = jax.random.normal(kb, case["shape"], dtype=case["dtype"])
        got = powered_absolute_loss(a, b, case["m"], pallas_min_elements=0,
                                    pallas_block_bytes=case["block"])
        got = jax.block_until_ready(got)
        want = jnp.mean(jnp.abs(a.astype(jnp.float32) - b.astype(jnp.float32)) ** case["m"])
        assert jnp.allclose(got.astype(jnp.float32), want,
                            rtol=case["tol"], atol=case["tol"]), (case, got, want)

    print("KERNEL_OK")
</pallas_src>

<mosaic_0001>
module attributes {stable_mosaic.version = 11 : i64} {
  func.func @_sum_pow_kernel(%arg0: i32, %arg1: i32, %arg2: memref<8x512xf32, #tpu.memory_space<vmem>>, %arg3: memref<8x512xf32, #tpu.memory_space<vmem>>, %arg4: memref<1x1xf32, #tpu.memory_space<smem>>, %arg5: memref<8x512xf32, #tpu.memory_space<vmem>>) attributes {dimension_semantics = [#tpu.dimension_semantics<arbitrary>, #tpu.dimension_semantics<arbitrary>], iteration_bounds = array<i64: 1, 1>, scalar_prefetch = 0 : i64, scratch_operands = 1 : i64, tpu.core_type = #tpu.core_type<tc>, window_params = [{transform_indices = @transform_0, window_bounds = array<i64: 8, 512>}, {transform_indices = @transform_1, window_bounds = array<i64: 8, 512>}, {transform_indices = @transform_2, window_bounds = array<i64: 1, 1>}]} {
    %c0_i32 = arith.constant 0 : i32
    %0 = arith.cmpi eq, %arg1, %c0_i32 : i32
    %1 = arith.extui %0 : i1 to i32
    %c0_i32_0 = arith.constant 0 : i32
    %2 = arith.cmpi ne, %1, %c0_i32_0 : i32
    scf.if %2 {
      %cst = arith.constant 0.000000e+00 : f32
      %19 = vector.broadcast %cst : f32 to vector<8x512xf32>
      %c0_9 = arith.constant 0 : index
      %c0_10 = arith.constant 0 : index
      %20 = vector.load %arg5[%c0_9, %c0_10] : memref<8x512xf32, #tpu.memory_space<vmem>>, vector<8x512xf32>
      tpu.vector_store %arg5[%c0_9, %c0_10], %19 {strides = array<i32>} : memref<8x512xf32, #tpu.memory_space<vmem>>, vector<8x512xf32>,
    } else {
    }
    %c0_i32_1 = arith.constant 0 : i32
    %c8_i32 = arith.constant 8 : i32
    %3 = arith.muli %c0_i32_1, %c8_i32 : i32
    %4 = tpu.assume_multiple %3, 8 : i32
    %5 = arith.index_cast %4 : i32 to index
    %c0 = arith.constant 0 : index
    %6 = vector.load %arg2[%5, %c0] : memref<8x512xf32, #tpu.memory_space<vmem>>, vector<8x512xf32>
    %7 = arith.index_cast %4 : i32 to index
    %c0_2 = arith.constant 0 : index
    %8 = vector.load %arg3[%7, %c0_2] : memref<8x512xf32, #tpu.memory_space<vmem>>, vector<8x512xf32>
    %9 = arith.subf %6, %8 : vector<8x512xf32>
    %10 = math.absf %9 : vector<8x512xf32>
    %11 = arith.mulf %10, %10 : vector<8x512xf32>
    %12 = arith.mulf %10, %11 : vector<8x512xf32>
    %c0_3 = arith.constant 0 : index
    %c0_4 = arith.constant 0 : index
    %13 = vector.load %arg5[%c0_3, %c0_4] : memref<8x512xf32, #tpu.memory_space<vmem>>, vector<8x512xf32>
    %14 = arith.addf %13, %12 : vector<8x512xf32>
    %c0_5 = arith.constant 0 : index
    %c0_6 = arith.constant 0 : index
    %15 = vector.load %arg5[%c0_5, %c0_6] : memref<8x512xf32, #tpu.memory_space<vmem>>, vector<8x512xf32>
    tpu.vector_store %arg5[%c0_5, %c0_6], %14 {strides = array<i32>} : memref<8x512xf32, #tpu.memory_space<vmem>>, vector<8x512xf32>,
    %c1_i32 = arith.constant 1 : i32
    %c0_i32_7 = arith.constant 0 : i32
    %16 = arith.cmpi eq, %arg1, %c0_i32_7 : i32
    %17 = arith.extui %16 : i1 to i32
    %c0_i32_8 = arith.constant 0 : i32
    %18 = arith.cmpi ne, %17, %c0_i32_8 : i32
    scf.if %18 {
      %c0_9 = arith.constant 0 : index
      %c0_10 = arith.constant 0 : index
      %19 = vector.load %arg5[%c0_9, %c0_10] : memref<8x512xf32, #tpu.memory_space<vmem>>, vector<8x512xf32>
      %20 = vector.shape_cast %19 : vector<8x512xf32> to vector<1x8x512xf32>
      %cst = arith.constant dense<0.000000e+00> : vector<1xf32>
      %21 = vector.multi_reduction <add>, %20, %cst [1, 2] : vector<1x8x512xf32> to vector<1xf32>
      %22 = vector.shape_cast %21 : vector<1xf32> to vector<1x1x1xf32>
      %23 = vector.extract %22[0, 0, 0] : f32 from vector<1x1x1xf32>
      %c0_11 = arith.constant 0 : index
      %c0_12 = arith.constant 0 : index
      %24 = memref.load %arg4[%c0_11, %c0_12] : memref<1x1xf32, #tpu.memory_space<smem>>
      memref.store %23, %arg4[%c0_11, %c0_12] : memref<1x1xf32, #tpu.memory_space<smem>>
    } else {
    }
    return
  }
  func.func @transform_0(%arg0: i32, %arg1: i32) -> (i32, i32) {
    %c1_i32 = arith.constant 1 : i32
    %0 = arith.muli %arg0, %c1_i32 : i32
    %1 = arith.addi %0, %arg1 : i32
    %c0_i32 = arith.constant 0 : i32
    %c0_i32_0 = arith.constant 0 : i32
    return %1, %c0_i32 : i32, i32
  }
  func.func @transform_1(%arg0: i32, %arg1: i32) -> (i32, i32) {
    %c1_i32 = arith.constant 1 : i32
    %0 = arith.muli %arg0, %c1_i32 : i32
    %1 = arith.addi %0, %arg1 : i32
    %c0_i32 = arith.constant 0 : i32
    %c0_i32_0 = arith.constant 0 : i32
    return %1, %c0_i32 : i32, i32
  }
  func.func @transform_2(%arg0: i32, %arg1: i32) -> (i32, i32) {
    %c0_i32 = arith.constant 0 : i32
    %c0_i32_0 = arith.constant 0 : i32
    return %arg0, %c0_i32 : i32, i32
  }
}

</mosaic_0001>

<bundles_post_ra>
// kernel: tpu_custom_call.1
= control target key start
LH: loop header
LB: loop body
LE: loop exit
PB: predicated region body
PF: predicated region fallthrough
CT: control target
= control target key end

     0   :  { %7 = vsyncpa [#allocation4], 0  ;;  %s217_s0 = inlined_call_operand.hbm [shape: f32[8,512], index: 0, kind: input, shape index: {}]   ;;  %s218_s1 = inlined_call_operand.hbm [shape: f32[8,512], index: 1, kind: input, shape index: {}]   ;;  %s219_s2 = inlined_call_operand.hbm [shape: f32[1,1], index: 2, kind: output, shape index: {}]  }
   0x1   :  { %8 = vsyncpa [#allocation7], 0 }
   0x2   :  { %9 = vsyncpa [#allocation5], 0  ;;  %s190_s9 = smov [#allocation3]   ;;  %s191_s11 = smov [#allocation6]  }
   0x3   :  { %s20_s10 = sshll.u32 %s190_s9, 4  ;;  %s34_s12 = sshll.u32 %s191_s11, 4  ;;  %s21_s10 = int_to_ptr.vmem [resolvable:$true] %s20_s10  ;;  %s35_s12 = int_to_ptr.vmem [resolvable:$true] %s34_s12 }
   0x4   :  { %s144_s13 = scalar_lea.vmem %s21_s10, 512  ;;  %p149_p1 = scmp.lt.s32.totalorder %s21_s10, %s21_s10 }
   0x5   :  { %p145_p0 = scmp.ne.s32.totalorder %s21_s10, %s144_s13  ;;  %p150_p2 = scmp.lt.s32.totalorder %s144_s13, %s144_s13 }
   0x7   :  { %p151_p3 = por %p150_p2, %p149_p1 }
   0x9   :  { %p152_p4 = pnand %p151_p3, %p145_p0 }
   0xb   :  { %155 = shalt.err (!%p152_p4)
}
   0xc   :  { %23 = dma.hbm_to_vmem [thread:$0]  %s217_s0, 512, %s21_s10, [#allocation4]  }
   0xd   :  { %s164_s16 = scalar_lea.vmem %s35_s12, 512  ;;  %p169_p6 = scmp.lt.s32.totalorder %s35_s12, %s35_s12 }
   0xe   :  { %p165_p5 = scmp.ne.s32.totalorder %s35_s12, %s164_s16  ;;  %p170_p7 = scmp.lt.s32.totalorder %s164_s16, %s164_s16 }
  0x10   :  { %p171_p8 = por %p170_p7, %p169_p6 }
  0x12   :  { %p172_p9 = pnand %p171_p8, %p165_p5 }
  0x14   :  { %175 = shalt.err (!%p172_p9)
}
  0x15   :  { %37 = dma.hbm_to_vmem [thread:$0]  %s218_s1, 512, %s35_s12, [#allocation7]  }
  0x16   :  { %184 = dma.done.wait [#allocation4], 512  }
  0x17   :  { %185 = vsyncadd [#allocation4], 4294966784 }
  0x18   :  { %186 = dma.done.wait [#allocation7], 512  }
  0x19   :  { %187 = vsyncadd [#allocation7], 4294966784  ;;  %v57_v0 = vld [vmem:[#allocation3] sm:$0xff]  ;;  %v58_v1 = vld [vmem:[#allocation3 + $0x8] sm:$0xff]  ;;  %s192_s1 = smov [#allocation8]  }
  0x1a   :  { %v59_v2 = vld [vmem:[#allocation3 + $0x10] sm:$0xff]  ;;  %v60_v3 = vld [vmem:[#allocation3 + $0x18] sm:$0xff]  ;;  %v63_v4 = vld [vmem:[#allocation6] sm:$0xff] }
  0x1b   :  { %v64_v5 = vld [vmem:[#allocation6 + $0x8] sm:$0xff]  ;;  %v65_v6 = vld [vmem:[#allocation6 + $0x10] sm:$0xff]  ;;  %v66_v7 = vld [vmem:[#allocation6 + $0x18] sm:$0xff]  ;;  %v67_v8 = vsub.f32 %v57_v0, %v63_v4 }
  0x1c   :  { %v68_v9 = vsub.f32 %v58_v1, %v64_v5  ;;  %v69_v10 = vsub.f32 %v59_v2, %v65_v6  ;;  %v70_v11 = vsub.f32 %v60_v3, %v66_v7 }
  0x1d   :  { %v71_v12 = vand.u32 2147483647, %v67_v8 }
  0x1e   :  { %v72_v13 = vand.u32 2147483647, %v68_v9  ;;  %v73_v14 = vand.u32 2147483647, %v69_v10  ;;  %v74_v15 = vand.u32 2147483647, %v70_v11 }
  0x1f   :  { %v75_v16 = vmul.f32 %v71_v12, %v71_v12 }
  0x20   :  { %v76_v17 = vmul.f32 %v72_v13, %v72_v13  ;;  %v77_v18 = vmul.f32 %v73_v14, %v73_v14  ;;  %v78_v19 = vmul.f32 %v74_v15, %v74_v15 }
  0x21   :  { %v79_v20 = vmul.f32 %v75_v16, %v71_v12 }
  0x22   :  { %v80_v21 = vmul.f32 %v76_v17, %v72_v13  ;;  %v81_v22 = vmul.f32 %v77_v18, %v73_v14  ;;  %v82_v23 = vmul.f32 %v78_v19, %v74_v15 }
  0x24   :  { %v102_v24 = vadd.f32 %v80_v21, %v79_v20 }
  0x26   :  { %v103_v25 = vadd.f32 %v102_v24, %v81_v22 }
  0x28   :  { %v104_v26 = vadd.f32 %v103_v25, %v82_v23 }
  0x2a   :  { %105 = vadd.xlane.f32.xlu0 %v104_v26 }
  0xb3   :  { %v106_v27 = vpop.xlane.xlu0 %105 }
  0xb4   :  { %v107_v28 = vrot.slane %v106_v27, 4 }
  0xb6   :  { %v108_v29 = vadd.f32 %v107_v28, %v106_v27 }
  0xb8   :  { %v109_v30 = vrot.slane %v108_v29, 2 }
  0xba   :  { %v110_v31 = vadd.f32 %v109_v30, %v108_v29 }
  0xbc   :  { %v111_v32 = vrot.slane %v110_v31, 1 }
  0xbe   :  { %v112_v33 = vadd.f32 %v111_v32, %v110_v31 }
  0xc0   :  { %131 = vpush %v112_v33 }
  0xf1   :  { %s132_s0 = spop %131 }
  0xf2   :  { %115 = sst [smem:[#allocation8]] %s132_s0 }
  0xf3   :  { %123 = dma.smem_to_hbm %s192_s1, 16, %s219_s2, [#allocation5]  }
  0xf4   :  { %188 = dma.done.wait [#allocation5], 16  }
  0xf5   :  { %189 = vsyncadd [#allocation5], 4294967280 }
  0xf6   :  { %127 = sfence }
  0xf7   :  { %128 = vsyncpa [#allocation4], 1 }
  0xf8   :  { %129 = vsyncpa [#allocation7], 1 }
  0xf9   :  { %130 = vsyncpa [#allocation5], 1 }

</bundles_post_ra>
